<compile_context>
chip_gen: v7x
topology: tpu7x:2x2x1
jax: 0.10.0
libtpu: 0.0.40
codegen_flags: <defaults>
</compile_context>

<pallas_src>
import jax
import jax.numpy as jnp
from jax.experimental import pallas as pl
from jax.experimental.pallas import tpu as pltpu

# ---- model hyper-parameters (small, consistent with the module) ----
VOCAB_SIZE = 100
EMBED_DIM = 32
NUM_FILTERS = 8
FILTER_SIZES = (3, 4, 5)
OUTPUT_DIM = 1          # fc path below assumes a single output unit (module default)
SEQ_LEN = 16
BATCH = 2
PADDING_IDX = 1

MAX_FS = max(FILTER_SIZES)                 # 5
K_FUSED = MAX_FS * EMBED_DIM               # 160: fused im2col contraction width
F_REAL = len(FILTER_SIZES) * NUM_FILTERS   # 24 real output channels
F_PAD = 128                                # lane-dense padded channel axis
V_PAD = 128                                # padded vocab rows (MXU K for the one-hot lookup)


def sentiment_cnn_kernel(ids_ref, table_ref, w_slab_ref, bias_ref, mask_ref,
                         fc_row_ref, fc_b_ref, out_ref):
    """Fused embedding + conv(all sizes) + ReLU + masked max-pool + fc + sigmoid."""
    m = ids_ref.shape[0]                   # b_tile * SEQ_LEN rows
    bt = m // SEQ_LEN

    # ---- in-kernel embedding lookup: one-hot @ table on the MXU (bf16 operands) ----
    vocab_iota = jax.lax.broadcasted_iota(jnp.int32, (m, V_PAD), 1)
    onehot = (vocab_iota == ids_ref[...]).astype(jnp.bfloat16)            # (m, 128)
    emb = jnp.dot(onehot, table_ref[...],
                  preferred_element_type=jnp.float32)                     # (m, E) f32

    # ---- fused im2col: tap k = rows shifted "up" by k via XLU sublane rotation ----
    # Rows whose window runs past the end of a sequence pick up neighbouring-row data;
    # those time positions are zeroed by the pool mask below (exact, since ReLU >= 0
    # and padded channels carry zero weights/bias).  Rolls stay f32 (32-bit rotates);
    # each column is cast to bf16 before the lane-concat -> 160-wide bf16 slab.
    cols = [emb.astype(jnp.bfloat16)]
    for k in range(1, MAX_FS):
        cols.append(pltpu.roll(emb, m - k, axis=0).astype(jnp.bfloat16))  # == roll by -k
    im2col = jnp.concatenate(cols, axis=-1)                               # (m, 160) bf16

    # ---- single MXU pass over all taps and all filter sizes (N=128 lane-dense) ----
    acts = jnp.dot(im2col, w_slab_ref[...],
                   preferred_element_type=jnp.float32)                    # (m, 128) f32
    acts = jnp.maximum(acts + bias_ref[...], 0.0)                         # bias + ReLU (f32)
    acts = acts.reshape(bt, SEQ_LEN, F_PAD)

    # ---- masked max-pool over time: host-precomputed mask, one vmul + max ----
    pooled = jnp.max(acts * mask_ref[...][None, :, :], axis=1)            # (bt, 128)

    # TODO(synk): dropout omitted -- eval-mode (identity) semantics used.
    # ---- fc (24 real inputs -> 1 output): VPU multiply + XLU lane reduction ----
    logits = jnp.sum(pooled * fc_row_ref[...], axis=-1, keepdims=True) + fc_b_ref[...]
    out_ref[...] = jax.nn.sigmoid(logits).astype(out_ref.dtype)           # (bt, 1)


def init_params(key):
    """Torch-layout parameters (Embedding, per-size Conv2d weights, Linear)."""
    keys = jax.random.split(key, 3 + 2 * len(FILTER_SIZES))
    embedding = jax.random.normal(keys[0], (VOCAB_SIZE, EMBED_DIM), jnp.float32) * 0.1
    embedding = embedding.at[PADDING_IDX].set(0.0)            # padding_idx=1 -> zero row
    conv_w, conv_b = [], []
    for i, fs in enumerate(FILTER_SIZES):
        conv_w.append(jax.random.normal(
            keys[1 + 2 * i], (NUM_FILTERS, fs, EMBED_DIM), jnp.float32) * 0.1)
        conv_b.append(jax.random.normal(
            keys[2 + 2 * i], (NUM_FILTERS,), jnp.float32) * 0.1)
    fc_w = jax.random.normal(keys[-2], (OUTPUT_DIM, F_REAL), jnp.float32) * 0.1
    fc_b = jax.random.normal(keys[-1], (OUTPUT_DIM,), jnp.float32) * 0.1
    return dict(embedding=embedding, conv_w=conv_w, conv_b=conv_b, fc_w=fc_w, fc_b=fc_b)


def pack_params(params):
    """One-time host-side packing into fused, pre-transposed, lane-dense layouts."""
    # Embedding table padded to 128 vocab rows (bf16, MXU K for the one-hot lookup).
    table = jnp.zeros((V_PAD, EMBED_DIM), jnp.float32)
    table = table.at[:VOCAB_SIZE].set(params["embedding"])
    # Fused conv weight slab: rows [k*E:(k+1)*E] = tap k, cols [i*F:(i+1)*F] = filter size i.
    w_slab = jnp.zeros((K_FUSED, F_PAD), jnp.float32)
    bias = jnp.zeros((1, F_PAD), jnp.float32)
    # Time-validity mask: mask[t, c] = 1 iff t is a valid output position for channel c's
    # filter size.  Padded channels stay 1 (their activations are exactly 0 anyway).
    mask = jnp.ones((SEQ_LEN, F_PAD), jnp.float32)
    for i, fs in enumerate(FILTER_SIZES):
        w = params["conv_w"][i]                       # (F, fs, E)
        c0 = i * NUM_FILTERS
        for k in range(fs):
            w_slab = w_slab.at[k * EMBED_DIM:(k + 1) * EMBED_DIM,
                               c0:c0 + NUM_FILTERS].set(w[:, k, :].T)
        bias = bias.at[0, c0:c0 + NUM_FILTERS].set(params["conv_b"][i])
        valid_t = (jnp.arange(SEQ_LEN) < (SEQ_LEN - fs + 1)).astype(jnp.float32)
        mask = mask.at[:, c0:c0 + NUM_FILTERS].set(
            jnp.broadcast_to(valid_t[:, None], (SEQ_LEN, NUM_FILTERS)))
    # fc: single real output unit -> one lane-dense row vector for the VPU/XLU reduction.
    fc_row = jnp.zeros((1, F_PAD), jnp.float32).at[0, :F_REAL].set(params["fc_w"][0])
    fc_b = params["fc_b"].reshape(1, 1).astype(jnp.float32)
    # NOTE(v7x): keep the MXU path bf16 (v7x MXU has no int8 support); int8 weights only
    # pay off on v5e/v6e.
    return dict(table=table.astype(jnp.bfloat16),
                w_slab=w_slab.astype(jnp.bfloat16),
                bias=bias, mask=mask, fc_row=fc_row, fc_b=fc_b)


@jax.jit
def sentiment_cnn_forward(token_ids, packed):
    b, s = token_ids.shape
    ids2d = token_ids.reshape(b * s, 1).astype(jnp.int32)   # id per im2col row, 1 lane

    # Toy batch: a single grid step.  At realistic batch choose b_tile so that
    # M = b_tile*S >= 256 (multiple of 8), keep >= 2 steps for v7x's two TensorCores,
    # and raise vmem_limit_bytes via pltpu.CompilerParams for large tiles.
    b_tile = b
    grid = (b // b_tile,)
    resident = lambda i: (0, 0)   # weights/constants: same block every step -> VMEM-resident

    return pl.pallas_call(
        sentiment_cnn_kernel,
        grid=grid,
        in_specs=[
            pl.BlockSpec((b_tile * s, 1), lambda i: (i, 0)),        # token ids
            pl.BlockSpec((V_PAD, EMBED_DIM), resident),             # embedding table (bf16)
            pl.BlockSpec((K_FUSED, F_PAD), resident),               # fused conv weights (bf16)
            pl.BlockSpec((1, F_PAD), resident),                     # conv bias (f32)
            pl.BlockSpec((SEQ_LEN, F_PAD), resident),               # time-validity mask (f32)
            pl.BlockSpec((1, F_PAD), resident),                     # fc weight row (f32)
            pl.BlockSpec((1, 1), resident),                         # fc bias (f32)
        ],
        out_specs=pl.BlockSpec((b_tile, OUTPUT_DIM), lambda i: (i, 0)),
        out_shape=jax.ShapeDtypeStruct((b, OUTPUT_DIM), jnp.float32),
        compiler_params=pltpu.CompilerParams(dimension_semantics=("parallel",)),
    )(ids2d, packed["table"], packed["w_slab"], packed["bias"],
      packed["mask"], packed["fc_row"], packed["fc_b"])


def reference_forward(token_ids, params):
    """Pure-JAX f32 reference for correctness checking (mirrors the torch module)."""
    emb = jnp.take(params["embedding"], token_ids, axis=0)    # (B, S, E)
    pooled = []
    for i, fs in enumerate(FILTER_SIZES):
        w = params["conv_w"][i]                               # (F, fs, E)
        t_out = SEQ_LEN - fs + 1
        conv = jnp.zeros((token_ids.shape[0], t_out, NUM_FILTERS), jnp.float32)
        for k in range(fs):
            conv = conv + jnp.einsum("bte,fe->btf", emb[:, k:k + t_out, :], w[:, k, :])
        conv = jax.nn.relu(conv + params["conv_b"][i][None, None, :])
        pooled.append(jnp.max(conv, axis=1))
    cat = jnp.concatenate(pooled, axis=-1)
    return jax.nn.sigmoid(cat @ params["fc_w"].T + params["fc_b"][None, :])


if __name__ == "__main__":
    key = jax.random.PRNGKey(0)
    k_param, k_tok = jax.random.split(key)
    params = init_params(k_param)
    packed = pack_params(params)      # one-time host-side weight fusing / transposing
    token_ids = jax.random.randint(k_tok, (BATCH, SEQ_LEN), 0, VOCAB_SIZE, jnp.int32)

    out = jax.block_until_ready(sentiment_cnn_forward(token_ids, packed))
    ref = jax.block_until_ready(reference_forward(token_ids, params))
    assert out.shape == (BATCH, OUTPUT_DIM)
    err = float(jnp.max(jnp.abs(out - ref)))
    # bf16 MXU operands vs. f32 reference: expect ~1e-3-level differences.
    assert err < 2e-2, err

    print("KERNEL_OK")
</pallas_src>

<mosaic_0001>
module attributes {stable_mosaic.version = 11 : i64} {
  func.func @sentiment_cnn_kernel(%arg0: i32, %arg1: memref<32x1xi32, #tpu.memory_space<vmem>>, %arg2: memref<128x32xbf16, #tpu.memory_space<vmem>>, %arg3: memref<160x128xbf16, #tpu.memory_space<vmem>>, %arg4: memref<1x128xf32, #tpu.memory_space<vmem>>, %arg5: memref<16x128xf32, #tpu.memory_space<vmem>>, %arg6: memref<1x128xf32, #tpu.memory_space<vmem>>, %arg7: memref<1x1xf32, #tpu.memory_space<vmem>>, %arg8: memref<2x1xf32, #tpu.memory_space<vmem>>) attributes {dimension_semantics = [#tpu.dimension_semantics<parallel>], iteration_bounds = array<i64: 1>, scalar_prefetch = 0 : i64, scratch_operands = 0 : i64, tpu.core_type = #tpu.core_type<tc>, window_params = [{transform_indices = @transform_0, window_bounds = array<i64: 32, 1>}, {pipeline_mode = #tpu.pipeline_mode<synchronous>, transform_indices = @transform_1, window_bounds = array<i64: 128, 32>}, {pipeline_mode = #tpu.pipeline_mode<synchronous>, transform_indices = @transform_2, window_bounds = array<i64: 160, 128>}, {pipeline_mode = #tpu.pipeline_mode<synchronous>, transform_indices = @transform_3, window_bounds = array<i64: 1, 128>}, {pipeline_mode = #tpu.pipeline_mode<synchronous>, transform_indices = @transform_4, window_bounds = array<i64: 16, 128>}, {pipeline_mode = #tpu.pipeline_mode<synchronous>, transform_indices = @transform_5, window_bounds = array<i64: 1, 128>}, {pipeline_mode = #tpu.pipeline_mode<synchronous>, transform_indices = @transform_6, window_bounds = array<i64: 1, 1>}, {transform_indices = @transform_7, window_bounds = array<i64: 2, 1>}]} {
    %0 = tpu.iota {dimensions = array<i32: 1>} : vector<32x128xi32>
    %c0 = arith.constant 0 : index
    %c0_0 = arith.constant 0 : index
    %1 = vector.load %arg1[%c0, %c0_0] : memref<32x1xi32, #tpu.memory_space<vmem>>, vector<32x1xi32>
    %2 = vector.broadcast %1 : vector<32x1xi32> to vector<32x128xi32>
    %3 = arith.cmpi eq, %0, %2 : vector<32x128xi32>
    %4 = arith.extui %3 : vector<32x128xi1> to vector<32x128xi32>
    %5 = arith.sitofp %4 : vector<32x128xi32> to vector<32x128xf32>
    %6 = arith.truncf %5 : vector<32x128xf32> to vector<32x128xbf16>
    %c0_1 = arith.constant 0 : index
    %c0_2 = arith.constant 0 : index
    %7 = vector.load %arg2[%c0_1, %c0_2] : memref<128x32xbf16, #tpu.memory_space<vmem>>, vector<128x32xbf16>
    %cst = arith.constant dense<0.000000e+00> : vector<32x32xf32>
    %8 = tpu.matmul %6, %7, %cst {dimension_numbers = #tpu.dot_dimension_numbers<[1], [0], [0], [1], [0, 0, 1, 1], [], []>} : vector<32x128xbf16>, vector<128x32xbf16>, vector<32x32xf32> -> vector<32x32xf32>
    %9 = arith.truncf %8 : vector<32x32xf32> to vector<32x32xbf16>
    %c31_i32 = arith.constant 31 : i32
    %10 = tpu.dynamic_rotate %8 by %c31_i32 dim 0 : vector<32x32xf32>, i32 -> vector<32x32xf32>
    %11 = arith.truncf %10 : vector<32x32xf32> to vector<32x32xbf16>
    %c30_i32 = arith.constant 30 : i32
    %12 = tpu.dynamic_rotate %8 by %c30_i32 dim 0 : vector<32x32xf32>, i32 -> vector<32x32xf32>
    %13 = arith.truncf %12 : vector<32x32xf32> to vector<32x32xbf16>
    %c29_i32 = arith.constant 29 : i32
    %14 = tpu.dynamic_rotate %8 by %c29_i32 dim 0 : vector<32x32xf32>, i32 -> vector<32x32xf32>
    %15 = arith.truncf %14 : vector<32x32xf32> to vector<32x32xbf16>
    %c28_i32 = arith.constant 28 : i32
    %16 = tpu.dynamic_rotate %8 by %c28_i32 dim 0 : vector<32x32xf32>, i32 -> vector<32x32xf32>
    %17 = arith.truncf %16 : vector<32x32xf32> to vector<32x32xbf16>
    %18 = tpu.concatenate %9, %11, %13, %15, %17 in 1 : vector<32x32xbf16>, vector<32x32xbf16>, vector<32x32xbf16>, vector<32x32xbf16>, vector<32x32xbf16> -> vector<32x160xbf16>
    %c0_3 = arith.constant 0 : index
    %c0_4 = arith.constant 0 : index
    %19 = vector.load %arg3[%c0_3, %c0_4] : memref<160x128xbf16, #tpu.memory_space<vmem>>, vector<160x128xbf16>
    %cst_5 = arith.constant dense<0.000000e+00> : vector<32x128xf32>
    %20 = tpu.matmul %18, %19, %cst_5 {dimension_numbers = #tpu.dot_dimension_numbers<[1], [0], [0], [1], [0, 0, 1, 1], [], []>} : vector<32x160xbf16>, vector<160x128xbf16>, vector<32x128xf32> -> vector<32x128xf32>
    %c0_6 = arith.constant 0 : index
    %c0_7 = arith.constant 0 : index
    %21 = vector.load %arg4[%c0_6, %c0_7] : memref<1x128xf32, #tpu.memory_space<vmem>>, vector<1x128xf32>
    %22 = vector.broadcast %21 : vector<1x128xf32> to vector<32x128xf32>
    %23 = arith.addf %20, %22 : vector<32x128xf32>
    %cst_8 = arith.constant 0.000000e+00 : f32
    %24 = vector.broadcast %cst_8 : f32 to vector<32x128xf32>
    %25 = arith.maximumf %23, %24 : vector<32x128xf32>
    %26 = vector.shape_cast %25 : vector<32x128xf32> to vector<2x16x128xf32>
    %c0_9 = arith.constant 0 : index
    %c0_10 = arith.constant 0 : index
    %27 = vector.load %arg5[%c0_9, %c0_10] : memref<16x128xf32, #tpu.memory_space<vmem>>, vector<16x128xf32>
    %28 = vector.shape_cast %27 : vector<16x128xf32> to vector<1x16x128xf32>
    %29 = vector.broadcast %28 : vector<1x16x128xf32> to vector<2x16x128xf32>
    %30 = arith.mulf %26, %29 : vector<2x16x128xf32>
    %cst_11 = arith.constant dense<0xFF800000> : vector<2x128xf32>
    %31 = vector.multi_reduction <maximumf>, %30, %cst_11 [1] : vector<2x16x128xf32> to vector<2x128xf32>
    %c0_12 = arith.constant 0 : index
    %c0_13 = arith.constant 0 : index
    %32 = vector.load %arg6[%c0_12, %c0_13] : memref<1x128xf32, #tpu.memory_space<vmem>>, vector<1x128xf32>
    %33 = vector.broadcast %32 : vector<1x128xf32> to vector<2x128xf32>
    %34 = arith.mulf %31, %33 : vector<2x128xf32>
    %cst_14 = arith.constant dense<0.000000e+00> : vector<2xf32>
    %35 = vector.multi_reduction <add>, %34, %cst_14 [1] : vector<2x128xf32> to vector<2xf32>
    %36 = vector.shape_cast %35 : vector<2xf32> to vector<2x1xf32>
    %c0_15 = arith.constant 0 : index
    %c0_16 = arith.constant 0 : index
    %37 = vector.load %arg7[%c0_15, %c0_16] : memref<1x1xf32, #tpu.memory_space<vmem>>, vector<1x1xf32>
    %38 = vector.broadcast %37 : vector<1x1xf32> to vector<2x1xf32>
    %39 = arith.addf %36, %38 : vector<2x1xf32>
    %40 = arith.negf %39 : vector<2x1xf32>
    %41 = math.exp %40 : vector<2x1xf32>
    %cst_17 = arith.constant 1.000000e+00 : f32
    %42 = vector.broadcast %cst_17 : f32 to vector<2x1xf32>
    %43 = arith.addf %42, %41 : vector<2x1xf32>
    %44 = arith.divf %42, %43 : vector<2x1xf32>
    %c0_18 = arith.constant 0 : index
    %c0_19 = arith.constant 0 : index
    %45 = vector.load %arg8[%c0_18, %c0_19] : memref<2x1xf32, #tpu.memory_space<vmem>>, vector<2x1xf32>
    tpu.vector_store %arg8[%c0_18, %c0_19], %44 {strides = array<i32>} : memref<2x1xf32, #tpu.memory_space<vmem>>, vector<2x1xf32>,
    return
  }
  func.func @transform_0(%arg0: i32) -> (i32, i32) {
    %c0_i32 = arith.constant 0 : i32
    %c0_i32_0 = arith.constant 0 : i32
    return %arg0, %c0_i32 : i32, i32
  }
  func.func @transform_1(%arg0: i32) -> (i32, i32) {
    %c0_i32 = arith.constant 0 : i32
    %c0_i32_0 = arith.constant 0 : i32
    %c0_i32_1 = arith.constant 0 : i32
    return %c0_i32, %c0_i32_0 : i32, i32
  }
  func.func @transform_2(%arg0: i32) -> (i32, i32) {
    %c0_i32 = arith.constant 0 : i32
    %c0_i32_0 = arith.constant 0 : i32
    %c0_i32_1 = arith.constant 0 : i32
    return %c0_i32, %c0_i32_0 : i32, i32
  }
  func.func @transform_3(%arg0: i32) -> (i32, i32) {
    %c0_i32 = arith.constant 0 : i32
    %c0_i32_0 = arith.constant 0 : i32
    %c0_i32_1 = arith.constant 0 : i32
    return %c0_i32, %c0_i32_0 : i32, i32
  }
  func.func @transform_4(%arg0: i32) -> (i32, i32) {
    %c0_i32 = arith.constant 0 : i32
    %c0_i32_0 = arith.constant 0 : i32
    %c0_i32_1 = arith.constant 0 : i32
    return %c0_i32, %c0_i32_0 : i32, i32
  }
  func.func @transform_5(%arg0: i32) -> (i32, i32) {
    %c0_i32 = arith.constant 0 : i32
    %c0_i32_0 = arith.constant 0 : i32
    %c0_i32_1 = arith.constant 0 : i32
    return %c0_i32, %c0_i32_0 : i32, i32
  }
  func.func @transform_6(%arg0: i32) -> (i32, i32) {
    %c0_i32 = arith.constant 0 : i32
    %c0_i32_0 = arith.constant 0 : i32
    %c0_i32_1 = arith.constant 0 : i32
    return %c0_i32, %c0_i32_0 : i32, i32
  }
  func.func @transform_7(%arg0: i32) -> (i32, i32) {
    %c0_i32 = arith.constant 0 : i32
    %c0_i32_0 = arith.constant 0 : i32
    return %arg0, %c0_i32 : i32, i32
  }
}

</mosaic_0001>

<bundles_post_ra>
// kernel: sentiment_cnn_forward.1
= control target key start
LH: loop header
LB: loop body
LE: loop exit
PB: predicated region body
PF: predicated region fallthrough
CT: control target
= control target key end

     0   :  { %v555_v0 = vmov 0   ;;  %v29_v13 = vlaneseq  ;;  %v556_v19 = vmov 1.0|1.0   ;;  %vm240_vm7 = vcmask 261120   ;;  %s558_s19 = smov 32   ;;  %s559_s20 = smov 96   ;;  %s723_s0 = inlined_call_operand.vmem [shape: s32[32,1], index: 0, kind: input, shape index: {}]   ;;  %s724_s1 = inlined_call_operand.vmem [shape: bf16[128,32], index: 1, kind: input, shape index: {}]   ;;  %s725_s2 = inlined_call_operand.vmem [shape: bf16[160,128], index: 2, kind: input, shape index: {}]   ;;  %s726_s6 = inlined_call_operand.<no memory space> [shape: f32[1,1], index: 6, kind: input, shape index: {}]   ;;  %s727_s3 = inlined_call_operand.vmem [shape: f32[1,128], index: 3, kind: input, shape index: {}]   ;;  %s728_s4 = inlined_call_operand.vmem [shape: f32[16,128], index: 4, kind: input, shape index: {}]   ;;  %s729_s5 = inlined_call_operand.vmem [shape: f32[1,128], index: 5, kind: input, shape index: {}]   ;;  %s730_s7 = inlined_call_operand.vmem [shape: f32[2,1], index: 7, kind: output, shape index: {}]  }
   0x1   :  { %532 = vset.pattern.permute.xlu1 %v555_v0  ;;  %531 = vset.pattern.permute.xlu0 %v555_v0  ;;  %v33_v1 = vld [vmem:[%s723_s0 + $0x10] sm:$0xff]  ;;  %v31_v2 = vld [vmem:[%s723_s0] sm:$0xff]  ;;  %v34_v3 = vld [vmem:[%s723_s0 + $0x18] sm:$0xff]  ;;  %vm247_vm11 = vcmask 523264   ;;  %vm252_vm12 = vcmask 785408   ;;  %vm437_vm13 = vcmask 1041409  }
   0x2   :  { %42 = vperm.xlu1 %532, %v33_v1   ;;  %36 = vperm.xlu0 %531, %v31_v2   ;;  %v32_v4 = vld [vmem:[%s723_s0 + $0x8] sm:$0xff]  ;;  %v533_v5 = vld [vmem:[%s724_s1] sm:$0xff]   ;;  %v535_v7 = vld [vmem:[%s724_s1 + $0x10] sm:$0xff]   ;;  %v30_v16 = vand.u32 127, %v29_v13  ;;  %v181_v29 = vshrl.u32 %v29_v13, 7  ;;  %vm440_vm14 = vcmask 1041408  }
   0x3   :  { %352 = vmatprep.subr.bf16.mxu1 %v555_v0  ;;  %v534_v6 = vld [vmem:[%s724_s1 + $0x8] sm:$0xff]   ;;  %506 = vmatprep.subr.bf16.mxu0 %v533_v5  ;;  %v536_v8 = vld [vmem:[%s724_s1 + $0x18] sm:$0xff]   ;;  %v537_v9 = vld [vmem:[%s724_s1 + $0x20] sm:$0xff]   ;;  %vm458_vm15 = vcmask 1024  }
   0x4   :  { %507 = vmatpush3.bf16.msra.mxu0 %v533_v5  ;;  %v538_v10 = vld [vmem:[%s724_s1 + $0x28] sm:$0xff]   ;;  %v539_v11 = vld [vmem:[%s724_s1 + $0x30] sm:$0xff]   ;;  %v540_v12 = vld [vmem:[%s724_s1 + $0x38] sm:$0xff]   ;;  %vm215_vm6 = vcmp.lt.s32.totalorder %v181_v29, 4  ;;  %vm193_vm8 = vcmp.lt.s32.totalorder %v181_v29, 6  ;;  %vm182_vm9 = vcmp.lt.s32.totalorder %v181_v29, 7 }
   0x5   :  { %508 = vmatprep.subr.bf16.mxu0 %v534_v6  ;;  %v541_v20 = vld [vmem:[%s725_s2] sm:$0xff]   ;;  %v542_v21 = vld [vmem:[%s725_s2 + $0x8] sm:$0xff]   ;;  %v543_v22 = vld [vmem:[%s725_s2 + $0x10] sm:$0xff]   ;;  %vm204_vm10 = vcmp.lt.s32.totalorder %v181_v29, 5 }
   0x6   :  { %45 = vperm.xlu1 %532, %v34_v3   ;;  %39 = vperm.xlu0 %531, %v32_v4   ;;  %v544_v23 = vld [vmem:[%s725_s2 + $0x18] sm:$0xff]   ;;  %v545_v24 = vld [vmem:[%s725_s2 + $0x20] sm:$0xff]   ;;  %v546_v25 = vld [vmem:[%s725_s2 + $0x28] sm:$0xff]  }
   0x7   :  { %353 = vmatpush1.bf16.msra.mxu1 %v541_v20  ;;  %v547_v26 = vld [vmem:[%s725_s2 + $0x30] sm:$0xff]   ;;  %v548_v27 = vld [vmem:[%s725_s2 + $0x38] sm:$0xff]   ;;  %v549_v28 = vld [vmem:[%s725_s2 + $0x40] sm:$0xff]  }
   0x8   :  { %509 = vmatpush3.bf16.msra.mxu0 %v534_v6  ;;  %354 = vmatprep.subr.bf16.mxu1 %v555_v0  ;;  %v550_v30 = vld [vmem:[%s725_s2 + $0x48] sm:$0xff]   ;;  %s557_s2 = smov 64  }
   0x9   :  { %510 = vmatprep.subr.bf16.mxu0 %v535_v7 }
   0xb   :  { %355 = vmatpush1.bf16.msra.mxu1 %v542_v21 }
   0xc   :  { %511 = vmatpush3.bf16.msra.mxu0 %v535_v7  ;;  %356 = vmatprep.subr.bf16.mxu1 %v555_v0 }
   0xd   :  { %512 = vmatprep.subr.bf16.mxu0 %v536_v8 }
   0xf   :  { %357 = vmatpush1.bf16.msra.mxu1 %v543_v22 }
  0x10   :  { %513 = vmatpush3.bf16.msra.mxu0 %v536_v8  ;;  %358 = vmatprep.subr.bf16.mxu1 %v555_v0 }
  0x11   :  { %514 = vmatprep.subr.bf16.mxu0 %v537_v9 }
  0x13   :  { %359 = vmatpush1.bf16.msra.mxu1 %v544_v23 }
  0x14   :  { %515 = vmatpush3.bf16.msra.mxu0 %v537_v9  ;;  %360 = vmatprep.subr.bf16.mxu1 %v555_v0 }
  0x15   :  { %516 = vmatprep.subr.bf16.mxu0 %v538_v10 }
  0x17   :  { %361 = vmatpush1.bf16.msra.mxu1 %v545_v24 }
  0x18   :  { %517 = vmatpush3.bf16.msra.mxu0 %v538_v10  ;;  %362 = vmatprep.subr.bf16.mxu1 %v555_v0 }
  0x19   :  { %518 = vmatprep.subr.bf16.mxu0 %v539_v11 }
  0x1b   :  { %363 = vmatpush1.bf16.msra.mxu1 %v546_v25  ;;  %v12_v25 = vstv %s726_s6 }
  0x1c   :  { %519 = vmatpush3.bf16.msra.mxu0 %v539_v11  ;;  %364 = vmatprep.subr.bf16.mxu1 %v555_v0  ;;  %13 = vst [vmem:[#allocation2] sm:$0x1] %v12_v25 }
  0x1d   :  { %520 = vmatprep.subr.bf16.mxu0 %v540_v12 }
  0x1f   :  { %365 = vmatpush1.bf16.msra.mxu1 %v547_v26  ;;  %v480_v26 = vld [vmem:[%s727_s3] ss:$0 sm:$0xff] }
  0x20   :  { %521 = vmatpush3.bf16.msra.mxu0 %v540_v12  ;;  %366 = vmatprep.subr.bf16.mxu1 %v555_v0 }
  0x23   :  { %367 = vmatpush1.bf16.msra.mxu1 %v548_v27 }
  0x24   :  { %368 = vmatprep.subr.bf16.mxu1 %v555_v0 }
  0x27   :  { %369 = vmatpush1.bf16.msra.mxu1 %v549_v28 }
  0x28   :  { %370 = vmatprep.subr.bf16.mxu1 %v555_v0 }
  0x2b   :  { %371 = vmatpush1.bf16.msra.mxu1 %v550_v30 }
  0x81   :  { %v43_v14 = vpop.permute.xlu1 %42  ;;  %v37_v15 = vpop.permute.xlu0 %36 }
  0x82   :  { %vm49_vm0 = vcmp.eq.s32.totalorder %v30_v16, %v43_v14  ;;  %vm47_vm3 = vcmp.eq.s32.totalorder %v30_v16, %v37_v15 }
  0x85   :  { %v46_v17 = vpop.permute.xlu1 %45  ;;  %v40_v18 = vpop.permute.xlu0 %39 }
  0x86   :  { %vm50_vm1 = vcmp.eq.s32.totalorder %v30_v16, %v46_v17  ;;  %vm48_vm2 = vcmp.eq.s32.totalorder %v30_v16, %v40_v18 }
  0x87   :  { %vm478_vm4 = vmpackc.low %vm50_vm1, %vm49_vm0 }
  0x88   :  { %vm476_vm5 = vmpackc.low %vm48_vm2, %vm47_vm3 }
  0x89   :  { %522 = vmatprep.mubr.msk.bf16.mxu0 %vm476_vm5, %v556_v19 }
  0x8a   :  { %523 = vmatmul.mubr.msk.bf16.vlgmr.msra.gmra.mrb[0].mxu0 %vm478_vm4, %v556_v19 }
 0x15d   :  { %v678_v31 = vpop.f32.mrb[0].mxu0 }
 0x15e   :  { %v178_v32 = vrot.slane %v678_v31, 1  ;;  %v191_v33 = vrot.slane %v678_v31, 2  ;;  %v202_v34 = vrot.slane %v678_v31, 3  ;;  %v159_v35 = vpop.f32.mrb[1].mxu0  ;;  %v213_v36 = vrot.slane %v678_v31, 4 }
 0x15f   :  { %v176_v37 = vrot.slane %v159_v35, 1  ;;  %v189_v38 = vrot.slane %v159_v35, 2  ;;  %v200_v39 = vrot.slane %v159_v35, 3  ;;  %v525_v40 = vpop.f32.mrb[2].mxu0  ;;  %v211_v41 = vrot.slane %v159_v35, 4 }
 0x160   :  { %v179_v42 = vrot.slane %v525_v40, 1  ;;  %v192_v43 = vrot.slane %v525_v40, 2  ;;  %v203_v44 = vrot.slane %v525_v40, 3  ;;  %v214_v45 = vrot.slane %v525_v40, 4  ;;  %v162_v46 = vpop.f32.mrb[3].mxu0 }
 0x161   :  { %v174_v47 = vpack.c.bf16 %v162_v46, %v159_v35  ;;  %v177_v48 = vrot.slane %v162_v46, 1  ;;  %v190_v49 = vrot.slane %v162_v46, 2  ;;  %v201_v50 = vrot.slane %v162_v46, 3  ;;  %v406_v35 = vld [vmem:[%s728_s4 + $0x8] sm:$0xff] }
 0x162   :  { %v212_v51 = vrot.slane %v162_v46, 4  ;;  %v183_v52 = vsel %vm182_vm9, %v178_v32, %v179_v42  ;;  %v186_v53 = vsel %vm182_vm9, %v179_v42, %v176_v37  ;;  %v205_v54 = vsel %vm204_vm10, %v202_v34, %v203_v44 }
 0x163   :  { %v195_v55 = vsel %vm193_vm8, %v190_v49, %v191_v33  ;;  %v196_v56 = vsel %vm193_vm8, %v189_v38, %v190_v49  ;;  %v184_v57 = vsel %vm182_vm9, %v177_v48, %v178_v32  ;;  %v185_v58 = vsel %vm182_vm9, %v176_v37, %v177_v48 }
 0x164   :  { %v217_v59 = vsel %vm215_vm6, %v212_v51, %v213_v36  ;;  %v218_v60 = vsel %vm215_vm6, %v211_v41, %v212_v51  ;;  %v198_v61 = vpack.c.bf16 %v195_v55, %v196_v56  ;;  %v187_v62 = vpack.c.bf16 %v184_v57, %v185_v58 }
 0x165   :  { %v220_v63 = vpack.c.bf16 %v217_v59, %v218_v60  ;;  %v188_v0 = vpack.c.bf16 %v186_v53, %v183_v52  ;;  %v206_v1 = vsel %vm204_vm10, %v201_v50, %v202_v34  ;;  %v207_v2 = vsel %vm204_vm10, %v200_v39, %v201_v50  ;;  %v405_v34 = vld [vmem:[%s728_s4] sm:$0xff] }
 0x166   :  { %230 = vrot.lane.b32.xlu1 %v198_v61, %s557_s2  ;;  %224 = vrot.lane.b32.xlu0 %v187_v62, %s558_s19  ;;  %v209_v3 = vpack.c.bf16 %v206_v1, %v207_v2  ;;  %v208_v4 = vsel %vm204_vm10, %v203_v44, %v200_v39  ;;  %v194_v5 = vsel %vm193_vm8, %v191_v33, %v192_v43 }
 0x167   :  { %491 = vmatprep.mubr.msk.bf16.mxu1 %vm240_vm7, %v220_v63  ;;  %v210_v6 = vpack.c.bf16 %v208_v4, %v205_v54  ;;  %v197_v7 = vsel %vm193_vm8, %v192_v43, %v189_v38  ;;  %v175_v8 = vpack.c.bf16 %v525_v40, %v678_v31  ;;  %v216_v9 = vsel %vm215_vm6, %v213_v36, %v214_v45  ;;  %v493_v63 = vld [vmem:[%s729_s5] ss:$0 sm:$0xff] }
 0x168   :  { %v199_v10 = vpack.c.bf16 %v197_v7, %v194_v5  ;;  %v219_v11 = vsel %vm215_vm6, %v214_v45, %v211_v41  ;;  %v494_v5 = vld [vmem:[#allocation2] ss:$0 sm:$0xff] }
 0x169   :  { %v221_v12 = vpack.c.bf16 %v219_v11, %v216_v9 }
 0x16a   :  { %226 = vrot.lane.b32.xlu1 %v188_v0, %s558_s19  ;;  %236 = vrot.lane.b32.xlu0 %v209_v3, %s559_s20 }
 0x16e   :  { %238 = vrot.lane.b32.xlu1 %v210_v6, %s559_s20  ;;  %232 = vrot.lane.b32.xlu0 %v199_v10, %s557_s2 }
 0x1d8   :  { %v231_v13 = vpop.permute.xlu1 %230  ;;  %v225_v14 = vpop.permute.xlu0 %224 }
 0x1d9   :  { %v243_v15 = vsel %vm240_vm7, %v174_v47, %v225_v14 }
 0x1da   :  { %v249_v18 = vsel %vm247_vm11, %v243_v15, %v231_v13 }
 0x1dc   :  { %v227_v16 = vpop.permute.xlu1 %226  ;;  %v237_v17 = vpop.permute.xlu0 %236 }
 0x1dd   :  { %v254_v19 = vsel %vm252_vm12, %v249_v18, %v237_v17  ;;  %v246_v21 = vsel %vm240_vm7, %v175_v8, %v227_v16 }
 0x1de   :  { %385 = vmatmul.mubr.bf16.vlgmr.msra.gmra.mrb[0].mxu1 %v254_v19 }
 0x1df   :  { %492 = vmatprep.mubr.msk.bf16.mxu1 %vm240_vm7, %v221_v12 }
 0x1e0   :  { %v233_v20 = vpop.permute.xlu0 %232  ;;  %v239_v22 = vpop.permute.xlu1 %238 }
 0x1e1   :  { %v251_v23 = vsel %vm247_vm11, %v246_v21, %v233_v20 }
 0x1e2   :  { %v257_v24 = vsel %vm252_vm12, %v251_v23, %v239_v22 }
 0x1e6   :  { %393 = vmatmul.mubr.bf16.gmra.mrb[4].mxu1 %v257_v24 }
 0x2b1   :  { %v386_v27 = vpop.f32.mrb[0].mxu1 }
 0x2b2   :  { %v387_v28 = vadd.f32 %v480_v26, %v386_v27  ;;  %v388_v29 = vpop.f32.mrb[1].mxu1 }
 0x2b3   :  { %v389_v30 = vpop.f32.mrb[2].mxu1 }
 0x2b4   :  { %v401_v31 = vmax.f32 %v387_v28, 0.0  ;;  %v390_v32 = vadd.f32 %v480_v26, %v389_v30  ;;  %v391_v33 = vpop.f32.mrb[3].mxu1 }
 0x2b6   :  { %v402_v36 = vmax.f32 %v390_v32, 0.0  ;;  %v407_v37 = vmul.f32 %v405_v34, %v401_v31 }
 0x2b8   :  { %v408_v38 = vmul.f32 %v406_v35, %v402_v36 }
 0x2b9   :  { %v394_v39 = vpop.f32.mrb[4].mxu1 }
 0x2ba   :  { %v411_v40 = vmax.f32 %v407_v37, %v408_v38  ;;  %v395_v41 = vadd.f32 %v480_v26, %v394_v39  ;;  %v396_v42 = vpop.f32.mrb[5].mxu1 }
 0x2bb   :  { %v397_v43 = vpop.f32.mrb[6].mxu1 }
 0x2bc   :  { %v412_v44 = vrot.slane %v411_v40, 4  ;;  %v403_v45 = vmax.f32 %v395_v41, 0.0  ;;  %v398_v46 = vadd.f32 %v480_v26, %v397_v43  ;;  %v399_v47 = vpop.f32.mrb[7].mxu1 }
 0x2be   :  { %v413_v48 = vmax.f32 %v411_v40, %v412_v44  ;;  %v404_v49 = vmax.f32 %v398_v46, 0.0  ;;  %v409_v50 = vmul.f32 %v405_v34, %v403_v45 }
 0x2c0   :  { %v410_v51 = vmul.f32 %v406_v35, %v404_v49  ;;  %v414_v52 = vrot.slane %v413_v48, 2 }
 0x2c2   :  { %v418_v53 = vmax.f32 %v409_v50, %v410_v51  ;;  %v415_v55 = vmax.f32 %v413_v48, %v414_v52 }
 0x2c4   :  { %v419_v54 = vrot.slane %v418_v53, 4  ;;  %v416_v59 = vrot.slane %v415_v55, 1 }
 0x2c6   :  { %v420_v56 = vmax.f32 %v418_v53, %v419_v54  ;;  %v417_v61 = vmax.f32 %v415_v55, %v416_v59 }
 0x2c8   :  { %v421_v57 = vrot.slane %v420_v56, 2  ;;  %v432_v1 = vmul.f32 %v493_v63, %v417_v61 }
 0x2ca   :  { %v422_v58 = vmax.f32 %v420_v56, %v421_v57 }
 0x2cc   :  { %v423_v60 = vrot.slane %v422_v58, 1 }
 0x2ce   :  { %v424_v62 = vmax.f32 %v422_v58, %v423_v60 }
 0x2d0   :  { %v433_v0 = vmul.f32 %v493_v63, %v424_v62 }
 0x2d2   :  { %v436_v2 = vrot.slane %v433_v0, 7 }
 0x2d4   :  { %v438_v3 = vsel %vm437_vm13, %v436_v2, %v432_v1 }
 0x2d5   :  { %v441_v4 = vsel %vm440_vm14, %v438_v3, 0.0 }
 0x2d6   :  { %442 = vadd.xlane.f32.xlu0 %v441_v4 }
 0x363   :  { %v443_v6 = vpop.xlane.xlu0 %442 }
 0x364   :  { %v451_v7 = vadd.f32 %v494_v5, %v443_v6 }
 0x366   :  { %v495_v8 = vmul.f32 -1.442695, %v451_v7 }
 0x368   :  { %551 = vpow2.f32 %v495_v8 }
 0x372   :  { %v552_v9 = vpop.eup %551 }
 0x373   :  { %v455_v10 = vadd.f32 1.0, %v552_v9 }
 0x375   :  { %553 = vrcp.f32 %v455_v10 }
 0x37f   :  { %v554_v11 = vpop.eup %553 }
 0x380   :  { %459 = vst.msk [vmem:[%s730_s7] sm:$0x3] %vm458_vm15, %v554_v11 }

</bundles_post_ra>
